<compile_context>
chip_gen: v7x
topology: tpu7x:2x2x1
jax: 0.10.0
libtpu: 0.0.40
codegen_flags: <defaults>
</compile_context>

<pallas_src>
import functools

import jax
import jax.numpy as jnp
from jax.experimental import pallas as pl
from jax.experimental.pallas import tpu as pltpu


def _roll_matmul_kernel(x_ref, r_ref, o_ref):
    """One lane-dense MXU matmul per grid step: out_rows = x_rows @ R_t.

    x_ref: (tile_rows, HW)    flattened-pixel rows (one row = one (H, W) plane).
    r_ref: (1, HW, HW)        fused row+column circular-roll permutation for t.
    o_ref: (1, tile_rows, HW)
    """
    o_ref[0] = jnp.dot(
        x_ref[...], r_ref[0], preferred_element_type=jnp.float32
    ).astype(o_ref.dtype)


def _roll_matrices(shifts, H, W, dtype):
    """Fused permutation matrices R with x_flat @ R[t] == roll(x, shifts[t]).

    roll semantics (torch.roll / jnp.roll): out[h, w] = x[(h - sy) % H, (w - sx) % W].
    With p = h*W + w and src(p) = ((h - sy) % H) * W + (w - sx) % W we need
    (x_flat @ R)[p] = x_flat[src(p)]  =>  R[q, p] = (q == src(p)).
    Exactly one nonzero per row/column -> matmul is exact for float inputs.
    """
    shifts = shifts.astype(jnp.int32)
    T = shifts.shape[0]
    sy = shifts[:, 0][:, None, None]                      # (T, 1, 1)
    sx = shifts[:, 1][:, None, None]
    h = jnp.arange(H, dtype=jnp.int32)
    w = jnp.arange(W, dtype=jnp.int32)
    src = ((h[:, None] - sy) % H) * W + ((w[None, :] - sx) % W)   # (T, H, W)
    src = src.reshape(T, H * W)                                   # (T, HW)
    q = jnp.arange(H * W, dtype=jnp.int32)
    R = q[None, :, None] == src[:, None, :]                       # (T, HW, HW)
    return R.astype(dtype)


def _pick_row_tile(rows, hw, itemsize, target_bytes=2 << 20):
    """Largest divisor of `rows` that is a multiple of 8 and <= ~target_bytes."""
    max_rows = max(8, (target_bytes // max(hw * itemsize, 1)) // 8 * 8)
    best = 8
    d = 8
    while d <= rows:
        if rows % d == 0 and d <= max_rows:
            best = d
        d += 8
    return best


@functools.partial(jax.jit, static_argnames=("n_trans",))
def _shift_transform_4d(x, shifts, n_trans):
    """x: (B, C, H, W); shifts: (n_trans, 2) int32 -> (n_trans*B, C, H, W)."""
    B, C, H, W = x.shape
    HW = H * W
    rows = B * C
    itemsize = jnp.dtype(x.dtype).itemsize

    # Lane-dense view: one row per (H, W) plane.
    xf = x.reshape(rows, HW)

    # Pad rows to a multiple of 8 so blocks satisfy the (8,128) constraint.
    rows_pad = (-rows) % 8
    if rows_pad:
        xf = jnp.pad(xf, ((0, rows_pad), (0, 0)))
    rows_p = rows + rows_pad

    tile_rows = _pick_row_tile(rows_p, HW, itemsize)
    num_row_tiles = rows_p // tile_rows

    R = _roll_matrices(shifts, H, W, x.dtype)             # (n_trans, HW, HW)

    blk_bytes = tile_rows * HW * itemsize
    r_bytes = HW * HW * itemsize
    flops = 2 * n_trans * rows_p * HW * HW
    bytes_accessed = (rows_p * HW + n_trans * HW * HW + n_trans * rows_p * HW) * itemsize

    # Keep double-buffered tiles + R under the scoped-VMEM default; only raise
    # the limit when blocks are large (stay well below v7x's 64 MiB physical).
    cp_kwargs = dict(dimension_semantics=("parallel", "parallel"))
    vmem_est = 4 * blk_bytes + 2 * r_bytes + (2 << 20)
    if vmem_est > (32 << 20):
        cp_kwargs["vmem_limit_bytes"] = min(vmem_est, 56 << 20)

    out = pl.pallas_call(
        _roll_matmul_kernel,
        out_shape=jax.ShapeDtypeStruct((n_trans, rows_p, HW), x.dtype),
        # t innermost: x's block index is t-independent, so each row tile is
        # DMA'd from HBM once and stays resident across the n_trans iterations.
        grid=(num_row_tiles, n_trans),
        in_specs=[
            pl.BlockSpec((tile_rows, HW), lambda r, t: (r, 0)),
            pl.BlockSpec((1, HW, HW), lambda r, t: (t, 0, 0)),
        ],
        out_specs=pl.BlockSpec((1, tile_rows, HW), lambda r, t: (t, r, 0)),
        compiler_params=pltpu.CompilerParams(**cp_kwargs),
        cost_estimate=pl.CostEstimate(
            flops=flops, transcendentals=0, bytes_accessed=bytes_accessed),
    )(xf, R)

    out = out[:, :rows]                                   # drop row padding
    # (n_trans, B*C, HW) -> (n_trans*B, C, H, W): [all of t0's batch, then t1's ...]
    return out.reshape(n_trans * B, C, H, W)


class ShiftTransform:
    """JAX/Pallas analogue of deepinv Transform (concretized as Shift)."""

    def __init__(self, n_trans: int = 1, rng=None, flatten_video_input: bool = True):
        self.n_trans = n_trans
        self.rng = jax.random.PRNGKey(0) if rng is None else rng
        self.flatten_video_input = flatten_video_input

    # --- Transform._check_x_5D ---
    @staticmethod
    def _check_x_5D(x):
        if x.ndim == 4:
            return False
        elif x.ndim == 5:
            return True
        raise ValueError("x must be either 4D or 5D.")

    # --- get_params (Shift._get_params): one (y_shift, x_shift) pair per n_trans ---
    # NOTE: mutates self.rng (Python-side state); do not wrap __call__ in jax.jit.
    def get_params(self, x):
        H, W = x.shape[-2:]
        self.rng, sub = jax.random.split(self.rng)
        sy = jax.random.randint(sub, (self.n_trans,), -(H // 2), H // 2 + 1, jnp.int32)
        self.rng, sub = jax.random.split(self.rng)
        sx = jax.random.randint(sub, (self.n_trans,), -(W // 2), W // 2 + 1, jnp.int32)
        return {"shifts": jnp.stack([sy, sx], axis=-1)}   # (n_trans, 2)

    def invert_params(self, params):
        return {k: -v for k, v in params.items()}

    # --- transform: handles 5D video flattening (flatten_C / wrap_flatten_C) ---
    def transform(self, x, shifts):
        if self._check_x_5D(x) and self.flatten_video_input:
            B, C, T, H, W = x.shape
            xf = x.reshape(B, C * T, H, W)
            out = _shift_transform_4d(xf, shifts, self.n_trans)
            return out.reshape(-1, C, T, H, W)
        return _shift_transform_4d(x, shifts, self.n_trans)

    # --- forward ---
    def __call__(self, x, **params):
        p = params if params else self.get_params(x)
        return self.transform(x, **p)

    def inverse(self, x, **params):
        p = params if params else self.get_params(x)
        return self.transform(x, **self.invert_params(p))


if __name__ == "__main__":
    key = jax.random.PRNGKey(0)
    kx, kv = jax.random.split(key)

    B, C, H, W = 2, 4, 16, 16
    n_trans = 2
    x = jax.random.normal(kx, (B, C, H, W), dtype=jnp.float32)

    t = ShiftTransform(n_trans=n_trans, rng=jax.random.PRNGKey(0))

    # Random forward (base-class forward semantics).
    out = jax.block_until_ready(t(x))
    assert out.shape == (n_trans * B, C, H, W), out.shape

    # Deterministic transform + reference check against jnp.roll.
    shifts = jnp.array([[3, -5], [-7, 2]], dtype=jnp.int32)
    out_det = jax.block_until_ready(t(x, shifts=shifts))
    ref = jnp.concatenate(
        [jnp.roll(x, (int(shifts[i, 0]), int(shifts[i, 1])), axis=(-2, -1))
         for i in range(n_trans)],
        axis=0,
    )
    assert jnp.allclose(out_det, ref, atol=1e-5), "mismatch vs roll reference"

    # Group property: inverse(transform(x)) == x (identity, pixelwise transform).
    single = ShiftTransform(n_trans=1, rng=jax.random.PRNGKey(1))
    s1 = jnp.array([[1, 0]], dtype=jnp.int32)
    y = single(single(x, shifts=s1), shifts=-s1)
    assert jnp.allclose(y, x, atol=1e-5)

    # Video (5D) input path: (B, C, T, H, W) flattened over time.
    xv = jax.random.normal(kv, (1, 1, 3, 16, 16), dtype=jnp.float32)
    out_v = jax.block_until_ready(t(xv))
    assert out_v.shape == (n_trans * 1, 1, 3, 16, 16), out_v.shape

    print("KERNEL_OK")
</pallas_src>

<mosaic_0001>
module attributes {stable_mosaic.version = 11 : i64} {
  func.func @_roll_matmul_kernel(%arg0: i32, %arg1: i32, %arg2: memref<8x256xf32, #tpu.memory_space<vmem>>, %arg3: memref<1x256x256xf32, #tpu.memory_space<vmem>>, %arg4: memref<1x8x256xf32, #tpu.memory_space<vmem>>) attributes {dimension_semantics = [#tpu.dimension_semantics<parallel>, #tpu.dimension_semantics<parallel>], iteration_bounds = array<i64: 1, 2>, scalar_prefetch = 0 : i64, scratch_operands = 0 : i64, tpu.core_type = #tpu.core_type<tc>, window_params = [{transform_indices = @transform_0, window_bounds = array<i64: 8, 256>}, {transform_indices = @transform_1, window_bounds = array<i64: 1, 256, 256>}, {transform_indices = @transform_2, window_bounds = array<i64: 1, 8, 256>}]} {
    %c0 = arith.constant 0 : index
    %c0_0 = arith.constant 0 : index
    %0 = vector.load %arg2[%c0, %c0_0] : memref<8x256xf32, #tpu.memory_space<vmem>>, vector<8x256xf32>
    %c0_1 = arith.constant 0 : index
    %c0_2 = arith.constant 0 : index
    %c0_3 = arith.constant 0 : index
    %1 = vector.load %arg3[%c0_1, %c0_2, %c0_3] : memref<1x256x256xf32, #tpu.memory_space<vmem>>, vector<1x256x256xf32>
    %2 = vector.shape_cast %1 : vector<1x256x256xf32> to vector<256x256xf32>
    %cst = arith.constant dense<0.000000e+00> : vector<8x256xf32>
    %3 = tpu.matmul %0, %2, %cst {dimension_numbers = #tpu.dot_dimension_numbers<[1], [0], [0], [1], [0, 0, 1, 1], [], []>} : vector<8x256xf32>, vector<256x256xf32>, vector<8x256xf32> -> vector<8x256xf32>
    %c0_4 = arith.constant 0 : index
    %c0_5 = arith.constant 0 : index
    %c0_6 = arith.constant 0 : index
    %4 = vector.load %arg4[%c0_4, %c0_5, %c0_6] : memref<1x8x256xf32, #tpu.memory_space<vmem>>, vector<1x8x256xf32>
    %5 = vector.shape_cast %4 : vector<1x8x256xf32> to vector<8x256xf32>
    %6 = vector.shape_cast %3 : vector<8x256xf32> to vector<1x8x256xf32>
    tpu.vector_store %arg4[%c0_4, %c0_5, %c0_6], %6 {strides = array<i32>} : memref<1x8x256xf32, #tpu.memory_space<vmem>>, vector<1x8x256xf32>,
    return
  }
  func.func @transform_0(%arg0: i32, %arg1: i32) -> (i32, i32) {
    %c0_i32 = arith.constant 0 : i32
    %c0_i32_0 = arith.constant 0 : i32
    return %arg0, %c0_i32 : i32, i32
  }
  func.func @transform_1(%arg0: i32, %arg1: i32) -> (i32, i32, i32) {
    %c0_i32 = arith.constant 0 : i32
    %c0_i32_0 = arith.constant 0 : i32
    %c0_i32_1 = arith.constant 0 : i32
    return %arg1, %c0_i32, %c0_i32_0 : i32, i32, i32
  }
  func.func @transform_2(%arg0: i32, %arg1: i32) -> (i32, i32, i32) {
    %c0_i32 = arith.constant 0 : i32
    %c0_i32_0 = arith.constant 0 : i32
    return %arg1, %arg0, %c0_i32 : i32, i32, i32
  }
}

</mosaic_0001>

<bundles_post_ra>
// kernel: _shift_transform_4d.1
= control target key start
LH: loop header
LB: loop body
LE: loop exit
PB: predicated region body
PF: predicated region fallthrough
CT: control target
= control target key end

     0   :  { %s565_s9 = smov 0   ;;  %s567_s10 = smov 0   ;;  %s674_s0 = inlined_call_operand.vmem [shape: f32[8,256], index: 0, kind: input, shape index: {}]   ;;  %s675_s1 = inlined_call_operand.vmem [shape: f32[2,256,256], index: 1, kind: input, shape index: {}]   ;;  %s676_s2 = inlined_call_operand.vmem [shape: f32[2,8,256], index: 2, kind: output, shape index: {}]  }
   0x1   :  { %s569_s11 = smov 0  }
   0x2 LB: > { %s21_s12 = sadd.s32 1, %s544_s10  ;;  %p429_p0 = scmp.ge.s32.totalorder %s548_s11, 1  ;;  %s548_s11 = sphi %s569_s11, %s12_s11   ;;  %s544_s10 = sphi %s567_s10, %s678_s10   ;;  %s540_s9 = sphi %s565_s9, %s677_s9  }
   0x3   : > { %p22_p1 = scmp.ge.s32.totalorder %s21_s12, 2  ;;  %p136_p2 = scmp.lt.s32.totalorder %s548_s11, 3 }
   0x5   : > { %s680_s12 = smov (%p22_p1, %s21_s12), 0  ;;  %p137_p3 = pnand %p429_p0, %p136_p2 }
   0x6   : > { %p172_p4 = scmp.lt.s32.totalorder (!%p137_p3), %s540_s9, 1  ;;  %v187_v0 = vld [vmem:[%s674_s0 + $0x8] sm:$0xff] (!%p137_p3) }
   0x7   : > { %140 = sbr.rel (%p137_p3) target bundleno = 298 (0x12a), region = 28  ;;  %316 = vmatprep.mubr.f32.mxu0 (!%p137_p3), %v187_v0 }
   0xe   : > { %s682_s9 = smov (!%p172_p4, %s540_s9), 1 }
   0xf   : > { %s436_s15 = sshll.u32 %s682_s9, 9  ;;  %s437_s21 = sshll.u32 %s682_s9, 4 }
  0x10   : > { %s592_s18 = scalar_lea.vmem %s675_s1, %s436_s15  ;;  %s185_s24 = scalar_lea.vmem %s676_s2, %s437_s21 }
  0x11   : > { %v189_v1 = vld [vmem:[%s592_s18 + $0x8] sm:$0xff]  ;;  %v191_v2 = vld [vmem:[%s592_s18 + $0x18] sm:$0xff]  ;;  %v188_v3 = vld [vmem:[%s592_s18] sm:$0xff] }
  0x12   : > { %v438_v4 = vpack.c.bf16 %v191_v2, %v189_v1  ;;  %v190_v5 = vld [vmem:[%s592_s18 + $0x10] sm:$0xff]  ;;  %v193_v6 = vld [vmem:[%s592_s18 + $0x28] sm:$0xff]  ;;  %v195_v7 = vld [vmem:[%s592_s18 + $0x38] sm:$0xff] }
  0x13   : > { %v440_v8 = vpack.c.bf16 %v190_v5, %v188_v3  ;;  %v442_v9 = vpack.c.bf16 %v195_v7, %v193_v6  ;;  %v192_v10 = vld [vmem:[%s592_s18 + $0x20] sm:$0xff]  ;;  %v194_v11 = vld [vmem:[%s592_s18 + $0x30] sm:$0xff]  ;;  %v197_v12 = vld [vmem:[%s592_s18 + $0x48] sm:$0xff] }
  0x14   : > { %439 = vmatprep.subr.bf16.mxu0 %v438_v4  ;;  %v199_v13 = vld [vmem:[%s592_s18 + $0x58] sm:$0xff]  ;;  %v444_v14 = vpack.c.bf16 %v194_v11, %v192_v10  ;;  %v196_v16 = vld [vmem:[%s592_s18 + $0x40] sm:$0xff]  ;;  %v198_v17 = vld [vmem:[%s592_s18 + $0x50] sm:$0xff] }
  0x15   : > { %441 = vmatpush1.bf16.msra.mxu0 %v440_v8  ;;  %v446_v15 = vpack.c.bf16 %v199_v13, %v197_v12  ;;  %v201_v18 = vld [vmem:[%s592_s18 + $0x68] sm:$0xff]  ;;  %v203_v19 = vld [vmem:[%s592_s18 + $0x78] sm:$0xff]  ;;  %v448_v20 = vpack.c.bf16 %v198_v17, %v196_v16  ;;  %v200_v22 = vld [vmem:[%s592_s18 + $0x60] sm:$0xff] }
  0x16   : > { %443 = vmatprep.subr.bf16.mxu0 %v442_v9  ;;  %v450_v21 = vpack.c.bf16 %v203_v19, %v201_v18  ;;  %v202_v23 = vld [vmem:[%s592_s18 + $0x70] sm:$0xff]  ;;  %v205_v24 = vld [vmem:[%s592_s18 + $0x88] sm:$0xff]  ;;  %v207_v25 = vld [vmem:[%s592_s18 + $0x98] sm:$0xff] }
  0x17   : > { %v452_v26 = vpack.c.bf16 %v202_v23, %v200_v22  ;;  %v454_v27 = vpack.c.bf16 %v207_v25, %v205_v24  ;;  %v204_v28 = vld [vmem:[%s592_s18 + $0x80] sm:$0xff]  ;;  %v206_v29 = vld [vmem:[%s592_s18 + $0x90] sm:$0xff]  ;;  %v209_v30 = vld [vmem:[%s592_s18 + $0xa8] sm:$0xff] }
  0x18   : > { %v211_v31 = vld [vmem:[%s592_s18 + $0xb8] sm:$0xff]  ;;  %v456_v32 = vpack.c.bf16 %v206_v29, %v204_v28  ;;  %v208_v34 = vld [vmem:[%s592_s18 + $0xa0] sm:$0xff]  ;;  %v210_v35 = vld [vmem:[%s592_s18 + $0xb0] sm:$0xff] }
  0x19   : > { %445 = vmatpush1.bf16.msra.mxu0 %v444_v14  ;;  %v458_v33 = vpack.c.bf16 %v211_v31, %v209_v30  ;;  %v213_v36 = vld [vmem:[%s592_s18 + $0xc8] sm:$0xff]  ;;  %v215_v37 = vld [vmem:[%s592_s18 + $0xd8] sm:$0xff]  ;;  %v460_v38 = vpack.c.bf16 %v210_v35, %v208_v34  ;;  %v212_v40 = vld [vmem:[%s592_s18 + $0xc0] sm:$0xff] }
  0x1a   : > { %447 = vmatprep.subr.bf16.mxu0 %v446_v15  ;;  %v462_v39 = vpack.c.bf16 %v215_v37, %v213_v36  ;;  %v214_v41 = vld [vmem:[%s592_s18 + $0xd0] sm:$0xff]  ;;  %v217_v42 = vld [vmem:[%s592_s18 + $0xe8] sm:$0xff]  ;;  %v219_v43 = vld [vmem:[%s592_s18 + $0xf8] sm:$0xff] }
  0x1b   : > { %v464_v44 = vpack.c.bf16 %v214_v41, %v212_v40  ;;  %v466_v45 = vpack.c.bf16 %v219_v43, %v217_v42  ;;  %v216_v46 = vld [vmem:[%s592_s18 + $0xe0] sm:$0xff]  ;;  %v218_v47 = vld [vmem:[%s592_s18 + $0xf0] sm:$0xff]  ;;  %v221_v48 = vld [vmem:[%s592_s18 + $0x108] sm:$0xff] }
  0x1c   : > { %v223_v49 = vld [vmem:[%s592_s18 + $0x118] sm:$0xff]  ;;  %v468_v50 = vpack.c.bf16 %v218_v47, %v216_v46  ;;  %v220_v52 = vld [vmem:[%s592_s18 + $0x100] sm:$0xff]  ;;  %v222_v53 = vld [vmem:[%s592_s18 + $0x110] sm:$0xff] }
  0x1d   : > { %449 = vmatpush1.bf16.msra.mxu0 %v448_v20  ;;  %v470_v51 = vpack.c.bf16 %v223_v49, %v221_v48  ;;  %v225_v54 = vld [vmem:[%s592_s18 + $0x128] sm:$0xff]  ;;  %v227_v55 = vld [vmem:[%s592_s18 + $0x138] sm:$0xff]  ;;  %v472_v56 = vpack.c.bf16 %v222_v53, %v220_v52  ;;  %v224_v58 = vld [vmem:[%s592_s18 + $0x120] sm:$0xff] }
  0x1e   : > { %451 = vmatprep.subr.bf16.mxu0 %v450_v21  ;;  %v474_v57 = vpack.c.bf16 %v227_v55, %v225_v54  ;;  %v226_v59 = vld [vmem:[%s592_s18 + $0x130] sm:$0xff]  ;;  %v229_v60 = vld [vmem:[%s592_s18 + $0x148] sm:$0xff]  ;;  %v231_v61 = vld [vmem:[%s592_s18 + $0x158] sm:$0xff] }
  0x1f   : > { %v476_v62 = vpack.c.bf16 %v226_v59, %v224_v58  ;;  %v478_v63 = vpack.c.bf16 %v231_v61, %v229_v60  ;;  %v228_v0 = vld [vmem:[%s592_s18 + $0x140] sm:$0xff]  ;;  %v230_v1 = vld [vmem:[%s592_s18 + $0x150] sm:$0xff]  ;;  %v233_v2 = vld [vmem:[%s592_s18 + $0x168] sm:$0xff] }
  0x20   : > { %v235_v3 = vld [vmem:[%s592_s18 + $0x178] sm:$0xff]  ;;  %v480_v4 = vpack.c.bf16 %v230_v1, %v228_v0  ;;  %v232_v6 = vld [vmem:[%s592_s18 + $0x160] sm:$0xff]  ;;  %v234_v7 = vld [vmem:[%s592_s18 + $0x170] sm:$0xff] }
  0x21   : > { %453 = vmatpush1.bf16.msra.mxu0 %v452_v26  ;;  %v482_v5 = vpack.c.bf16 %v235_v3, %v233_v2  ;;  %v237_v8 = vld [vmem:[%s592_s18 + $0x188] sm:$0xff]  ;;  %v239_v9 = vld [vmem:[%s592_s18 + $0x198] sm:$0xff]  ;;  %v484_v10 = vpack.c.bf16 %v234_v7, %v232_v6  ;;  %v236_v12 = vld [vmem:[%s592_s18 + $0x180] sm:$0xff] }
  0x22   : > { %455 = vmatprep.subr.bf16.mxu0 %v454_v27  ;;  %v486_v11 = vpack.c.bf16 %v239_v9, %v237_v8  ;;  %v238_v13 = vld [vmem:[%s592_s18 + $0x190] sm:$0xff]  ;;  %v241_v14 = vld [vmem:[%s592_s18 + $0x1a8] sm:$0xff]  ;;  %v243_v15 = vld [vmem:[%s592_s18 + $0x1b8] sm:$0xff] }
  0x23   : > { %v488_v16 = vpack.c.bf16 %v238_v13, %v236_v12  ;;  %v490_v17 = vpack.c.bf16 %v243_v15, %v241_v14  ;;  %v240_v18 = vld [vmem:[%s592_s18 + $0x1a0] sm:$0xff]  ;;  %v242_v19 = vld [vmem:[%s592_s18 + $0x1b0] sm:$0xff]  ;;  %v245_v20 = vld [vmem:[%s592_s18 + $0x1c8] sm:$0xff] }
  0x24   : > { %v247_v21 = vld [vmem:[%s592_s18 + $0x1d8] sm:$0xff]  ;;  %v492_v22 = vpack.c.bf16 %v242_v19, %v240_v18  ;;  %v244_v24 = vld [vmem:[%s592_s18 + $0x1c0] sm:$0xff]  ;;  %v246_v25 = vld [vmem:[%s592_s18 + $0x1d0] sm:$0xff] }
  0x25   : > { %457 = vmatpush1.bf16.msra.mxu0 %v456_v32  ;;  %v494_v23 = vpack.c.bf16 %v247_v21, %v245_v20  ;;  %v249_v26 = vld [vmem:[%s592_s18 + $0x1e8] sm:$0xff]  ;;  %v251_v27 = vld [vmem:[%s592_s18 + $0x1f8] sm:$0xff]  ;;  %v496_v28 = vpack.c.bf16 %v246_v25, %v244_v24  ;;  %v248_v30 = vld [vmem:[%s592_s18 + $0x1e0] sm:$0xff] }
  0x26   : > { %459 = vmatprep.subr.bf16.mxu0 %v458_v33  ;;  %v498_v29 = vpack.c.bf16 %v251_v27, %v249_v26  ;;  %v250_v31 = vld [vmem:[%s592_s18 + $0x1f0] sm:$0xff]  ;;  %v186_v33 = vld [vmem:[%s674_s0] sm:$0xff] }
  0x27   : > { %v500_v32 = vpack.c.bf16 %v250_v31, %v248_v30 }
  0x29   : > { %461 = vmatpush1.bf16.msra.mxu0 %v460_v38 }
  0x2a   : > { %463 = vmatprep.subr.bf16.mxu0 %v462_v39 }
  0x2d   : > { %465 = vmatpush1.bf16.msra.mxu0 %v464_v44 }
  0x2e   : > { %467 = vmatprep.subr.bf16.mxu0 %v466_v45 }
  0x31   : > { %469 = vmatpush1.bf16.msra.mxu0 %v468_v50 }
  0x32   : > { %471 = vmatprep.subr.bf16.mxu0 %v470_v51 }
  0x35   : > { %473 = vmatpush1.bf16.msra.mxu0 %v472_v56 }
  0x36   : > { %475 = vmatprep.subr.bf16.mxu0 %v474_v57 }
  0x39   : > { %477 = vmatpush1.bf16.msra.mxu0 %v476_v62 }
  0x3a   : > { %479 = vmatprep.subr.bf16.mxu0 %v478_v63 }
  0x3d   : > { %481 = vmatpush1.bf16.msra.mxu0 %v480_v4 }
  0x3e   : > { %483 = vmatprep.subr.bf16.mxu0 %v482_v5 }
  0x41   : > { %485 = vmatpush1.bf16.msra.mxu0 %v484_v10 }
  0x42   : > { %487 = vmatprep.subr.bf16.mxu0 %v486_v11 }
  0x45   : > { %489 = vmatpush1.bf16.msra.mxu0 %v488_v16 }
  0x46   : > { %491 = vmatprep.subr.bf16.mxu0 %v490_v17 }
  0x49   : > { %493 = vmatpush1.bf16.msra.mxu0 %v492_v22 }
  0x4a   : > { %495 = vmatprep.subr.bf16.mxu0 %v494_v23 }
  0x4d   : > { %497 = vmatpush1.bf16.msra.mxu0 %v496_v28 }
  0x4e   : > { %499 = vmatprep.subr.bf16.mxu0 %v498_v29 }
  0x51   : > { %501 = vmatpush1.bf16.msra.mxu0 %v500_v32 }
  0x54   : > { %317 = vmatmul.mubr.f32.vlgmr.msra.gmra.mrb[0].mxu0 %v186_v33 }
 0x127   : > { %v318_v34 = vpop.f32.mrb[0].mxu0 }
 0x128   : > { %323 = vst [vmem:[%s185_s24] sm:$0xff] %v318_v34  ;;  %v320_v35 = vpop.f32.mrb[1].mxu0 }
 0x129   : > { %324 = vst [vmem:[%s185_s24 + $0x8] sm:$0xff] %v320_v35 }
 0x12a PF: > { %s12_s11 = sadd.s32 1, %s548_s11   ;;  %s677_s9 = smov %s544_s10 }
 0x12b   : > { %p9_p5 = scmp.ge.s32.totalorder %s12_s11, 4   ;;  %s678_s10 = smov %s680_s12 }
 0x12d   :  { %11 = sbr.rel (!%p9_p5) target bundleno = 2 (0x2), region = 61 }

</bundles_post_ra>
